<compile_context>
chip_gen: v7x
topology: tpu7x:2x2x1
jax: 0.10.0
libtpu: 0.0.40
codegen_flags: <defaults>
</compile_context>

<pallas_src>
import jax
import jax.numpy as jnp
from jax import lax
from jax.experimental import pallas as pl
from jax.experimental.pallas import tpu as pltpu


# --------------------------------------------------------------------------- #
# VMEM budget / tile selection
# --------------------------------------------------------------------------- #
def _vmem_budget_bytes():
    """Scoped-VMEM budget per TensorCore, leaving headroom for Mosaic scratch.

    v7x has 64 MiB physical VMEM per core -> 48 MiB budget; v4/v5e/v6e have
    128 MiB -> 100 MiB (well above their 16/32 MiB default scoped limits).
    Unknown generations get the conservative 48 MiB.
    """
    kind = ""
    try:
        kind = jax.devices()[0].device_kind.lower()
    except Exception:
        pass
    if "v2" in kind or "v3" in kind:
        return 12 * 1024 * 1024
    if "v4" in kind or "v5" in kind or "v6" in kind:
        return 100 * 1024 * 1024
    return 48 * 1024 * 1024


def _tile_candidates(full, align, cap):
    """Legal Pallas tile sizes along one dim: the full extent, or power-of-two
    multiples of `align` (8 for sublanes, 128 for lanes) up to `cap`."""
    cands = set()
    if full <= cap:
        cands.add(full)
    t = align
    while t <= cap:
        if t < full:
            cands.add(t)
        t *= 2
    if not cands:
        cands.add(full)
    return sorted(cands, reverse=True)


def _pick_tiles(F, T, bytes_per_ft_elem, budget):
    """Largest (Ft, Tt) tile with bytes_per_ft_elem * Ft * Tt <= budget.

    bytes_per_ft_elem already accounts for B/C/M factors, double buffering and
    in-kernel f32 temporaries.  Returns None if nothing fits.
    """
    best, best_key = None, None
    for Ft in _tile_candidates(F, 8, F):
        for Tt in _tile_candidates(T, 128, max(T, 128)):
            if bytes_per_ft_elem * Ft * Tt > budget:
                continue
            key = (Ft * Tt, Tt, Ft)          # prefer big, then lane-dense
            if best_key is None or key > best_key:
                best_key, best = key, (Ft, Tt)
    return best


def _unit_phasor(re, im):
    """(cos(angle(z)), sin(angle(z))), with angle(0) := 0 (atan2 convention)."""
    mag2 = re * re + im * im
    valid = mag2 > 0.0
    inv = lax.rsqrt(jnp.where(valid, mag2, 1.0))
    return jnp.where(valid, re * inv, 1.0), jnp.where(valid, im * inv, 0.0)


# --------------------------------------------------------------------------- #
# Primary path: channels-resident single fused pass
# --------------------------------------------------------------------------- #
def _ipd_resident(real, imag, pair_idx, cos, out_dtype, budget, tiles):
    B, C, F, T = real.shape
    M = len(pair_idx)
    Ft, Tt = tiles

    # v7x megacore: if the whole problem is one grid step, split T so both
    # TensorCores get work (negligible extra step cost on single-core chips).
    if pl.cdiv(F, Ft) * pl.cdiv(T, Tt) < 2 and T >= 256:
        Tt = max(128, (((T + 1) // 2) // 128) * 128)

    nF, nT = pl.cdiv(F, Ft), pl.cdiv(T, Tt)

    def kernel(re_ref, im_ref, out_ref):
        re = re_ref[...].astype(jnp.float32)          # (B, C, Ft, Tt)
        im = im_ref[...].astype(jnp.float32)
        if cos:
            cph, sph = _unit_phasor(re, im)           # O(C) rsqrt per tile
            for m, (i, j) in enumerate(pair_idx):     # unrolled: static pairs
                out_ref[:, m] = (cph[:, i] * cph[:, j]
                                 + sph[:, i] * sph[:, j]).astype(out_dtype)
        else:
            ph = jnp.arctan2(im, re)                  # O(C) atan2 per tile
            for m, (i, j) in enumerate(pair_idx):
                out_ref[:, m] = (ph[:, i] - ph[:, j]).astype(out_dtype)

    out4 = pl.pallas_call(
        kernel,
        out_shape=jax.ShapeDtypeStruct((B, M, F, T), out_dtype),
        grid=(nF, nT),
        in_specs=[pl.BlockSpec((B, C, Ft, Tt), lambda f, t: (0, 0, f, t)),
                  pl.BlockSpec((B, C, Ft, Tt), lambda f, t: (0, 0, f, t))],
        out_specs=pl.BlockSpec((B, M, Ft, Tt), lambda f, t: (0, 0, f, t)),
        compiler_params=pltpu.CompilerParams(
            dimension_semantics=("parallel", "parallel"),
            vmem_limit_bytes=budget),
    )(real, imag)
    return out4.reshape(B, M * F, T)


# --------------------------------------------------------------------------- #
# Fallback path: scalar-prefetched pair-grid kernels (huge M / huge B*C)
# --------------------------------------------------------------------------- #
def _sorted_pair_indices(pair_idx):
    M = len(pair_idx)
    order = sorted(range(M), key=lambda m: pair_idx[m])   # group by channel i
    pi = jnp.asarray([pair_idx[m][0] for m in order], jnp.int32)
    pj = jnp.asarray([pair_idx[m][1] for m in order], jnp.int32)
    po = jnp.asarray(order, jnp.int32)                    # original output slot
    return pi, pj, po


def _ipd_pairs_cos(real, imag, pair_idx, out_dtype, budget):
    """Fused cos-IPD over a (F-tile, T-tile, pair) grid; no intermediate array."""
    B, C, F, T = real.shape
    M = len(pair_idx)
    pi, pj, po = _sorted_pair_indices(pair_idx)

    in_item = real.dtype.itemsize
    out_item = jnp.dtype(out_dtype).itemsize
    bytes_per = 2 * (4 * B * in_item + B * out_item) + 8 * B * 4
    tiles = _pick_tiles(F, T, bytes_per, budget)
    if tiles is None:
        raise ValueError("IPD pair kernel: no (F, T) tile fits the VMEM budget")
    Ft, Tt = tiles
    nF, nT = pl.cdiv(F, Ft), pl.cdiv(T, Tt)

    def kernel(pi_ref, pj_ref, po_ref, ri_ref, ii_ref, rj_ref, ij_ref, out_ref):
        ri = ri_ref[...].astype(jnp.float32)
        ii = ii_ref[...].astype(jnp.float32)
        rj = rj_ref[...].astype(jnp.float32)
        ij = ij_ref[...].astype(jnp.float32)
        ci, si = _unit_phasor(ri, ii)
        cj, sj = _unit_phasor(rj, ij)
        out_ref[...] = (ci * cj + si * sj).astype(out_ref.dtype)

    blk = (B, None, Ft, Tt)
    spec_i = pl.BlockSpec(blk, lambda f, t, m, pi_r, pj_r, po_r: (0, pi_r[m], f, t))
    spec_j = pl.BlockSpec(blk, lambda f, t, m, pi_r, pj_r, po_r: (0, pj_r[m], f, t))
    out_spec = pl.BlockSpec(blk, lambda f, t, m, pi_r, pj_r, po_r: (0, po_r[m], f, t))

    out4 = pl.pallas_call(
        kernel,
        out_shape=jax.ShapeDtypeStruct((B, M, F, T), out_dtype),
        grid_spec=pltpu.PrefetchScalarGridSpec(
            num_scalar_prefetch=3,
            grid=(nF, nT, M),
            in_specs=[spec_i, spec_i, spec_j, spec_j],
            out_specs=out_spec),
        compiler_params=pltpu.CompilerParams(
            # keep pairs sequential (channel-i DMA reuse); F/T axes feed megacore
            dimension_semantics=("parallel", "parallel", "arbitrary"),
            vmem_limit_bytes=budget),
    )(pi, pj, po, real, imag, real, imag)
    return out4.reshape(B, M * F, T)


def _ipd_pairs_raw(real, imag, pair_idx, out_dtype, budget):
    """Raw phase-difference fallback: O(C) atan2 precompute, then pair subtract."""
    B, C, F, T = real.shape
    M = len(pair_idx)
    in_item = real.dtype.itemsize
    out_item = jnp.dtype(out_dtype).itemsize

    # pass 1: per-channel phase (keeps atan2 work at O(C), not O(M))
    bytes_per1 = 2 * (2 * B * in_item + B * 4) + 4 * B * 4
    tiles1 = _pick_tiles(F, T, bytes_per1, budget)
    if tiles1 is None:
        raise ValueError("IPD phase kernel: no (F, T) tile fits the VMEM budget")
    Ft1, Tt1 = tiles1
    nF1, nT1 = pl.cdiv(F, Ft1), pl.cdiv(T, Tt1)

    def phase_kernel(re_ref, im_ref, ph_ref):
        ph_ref[...] = jnp.arctan2(im_ref[...].astype(jnp.float32),
                                  re_ref[...].astype(jnp.float32))

    blk1 = (B, None, Ft1, Tt1)
    phase = pl.pallas_call(
        phase_kernel,
        out_shape=jax.ShapeDtypeStruct((B, C, F, T), jnp.float32),
        grid=(C, nF1, nT1),
        in_specs=[pl.BlockSpec(blk1, lambda c, f, t: (0, c, f, t)),
                  pl.BlockSpec(blk1, lambda c, f, t: (0, c, f, t))],
        out_specs=pl.BlockSpec(blk1, lambda c, f, t: (0, c, f, t)),
        compiler_params=pltpu.CompilerParams(
            dimension_semantics=("parallel", "parallel", "parallel"),
            vmem_limit_bytes=budget),
    )(real, imag)

    # pass 2: pair subtraction (pure memory-bound)
    pi, pj, po = _sorted_pair_indices(pair_idx)
    bytes_per2 = 2 * (2 * B * 4 + B * out_item) + 2 * B * 4
    tiles2 = _pick_tiles(F, T, bytes_per2, budget)
    if tiles2 is None:
        raise ValueError("IPD diff kernel: no (F, T) tile fits the VMEM budget")
    Ft2, Tt2 = tiles2
    nF2, nT2 = pl.cdiv(F, Ft2), pl.cdiv(T, Tt2)

    def diff_kernel(pi_ref, pj_ref, po_ref, phi_ref, phj_ref, out_ref):
        out_ref[...] = (phi_ref[...] - phj_ref[...]).astype(out_ref.dtype)

    blk2 = (B, None, Ft2, Tt2)
    spec_i = pl.BlockSpec(blk2, lambda f, t, m, pi_r, pj_r, po_r: (0, pi_r[m], f, t))
    spec_j = pl.BlockSpec(blk2, lambda f, t, m, pi_r, pj_r, po_r: (0, pj_r[m], f, t))
    out_spec = pl.BlockSpec(blk2, lambda f, t, m, pi_r, pj_r, po_r: (0, po_r[m], f, t))

    out4 = pl.pallas_call(
        diff_kernel,
        out_shape=jax.ShapeDtypeStruct((B, M, F, T), out_dtype),
        grid_spec=pltpu.PrefetchScalarGridSpec(
            num_scalar_prefetch=3,
            grid=(nF2, nT2, M),
            in_specs=[spec_i, spec_j],
            out_specs=out_spec),
        compiler_params=pltpu.CompilerParams(
            dimension_semantics=("parallel", "parallel", "arbitrary"),
            vmem_limit_bytes=budget),
    )(pi, pj, po, phase, phase)
    return out4.reshape(B, M * F, T)


# --------------------------------------------------------------------------- #
# Public wrapper
# --------------------------------------------------------------------------- #
def ipd_feature(real, imag, pair_idx=None, cos=True, _force=None):
    """Inter-channel phase difference.

    real, imag: (B, C, F, T) real/imag parts of the STFT (f32 or bf16)
    returns:    (B, M*F, T) in real.dtype, M = len(pair_idx)
    """
    real = jnp.asarray(real)
    imag = jnp.asarray(imag)
    B, C, F, T = real.shape
    if pair_idx is None:
        pair_idx = [(i, j) for i in range(C) for j in range(i + 1, C)]
    pair_idx = [(int(i), int(j)) for i, j in pair_idx]
    for i, j in pair_idx:           # host-side bounds check (indices drive DMAs)
        if not (0 <= i < C and 0 <= j < C):
            raise ValueError(f"pair index {(i, j)} out of range for C={C}")
    M = len(pair_idx)
    out_dtype = real.dtype
    if M == 0:
        return jnp.zeros((B, 0, T), out_dtype)

    budget = _vmem_budget_bytes()
    in_item = real.dtype.itemsize
    out_item = jnp.dtype(out_dtype).itemsize

    # channels-resident single pass: working set per (f, t) element is
    # 2 x (2*C inputs + M outputs) buffers + f32 temporaries for C phasors.
    res_bytes_per = (2 * (2 * B * C * in_item + M * B * out_item)
                     + 4 * B * C * 4)
    res_tiles = _pick_tiles(F, T, res_bytes_per, budget)

    use_resident = res_tiles is not None
    if _force == "pairs":
        use_resident = False
    elif _force == "resident" and res_tiles is None:
        raise ValueError("channels-resident path does not fit the VMEM budget")

    if use_resident:
        return _ipd_resident(real, imag, pair_idx, cos, out_dtype, budget, res_tiles)
    if cos:
        return _ipd_pairs_cos(real, imag, pair_idx, out_dtype, budget)
    return _ipd_pairs_raw(real, imag, pair_idx, out_dtype, budget)


def ipd_feature_ref(real, imag, pair_idx=None, cos=True):
    """Pure-JAX reference matching the PyTorch forward."""
    B, C, F, T = real.shape
    if pair_idx is None:
        pair_idx = [(i, j) for i in range(C) for j in range(i + 1, C)]
    phase = jnp.arctan2(imag, real)          # th.angle
    ipd = jnp.concatenate([phase[:, i] - phase[:, j] for i, j in pair_idx], axis=1)
    if cos:
        ipd = jnp.cos(ipd)
    return ipd


if __name__ == "__main__":
    # Small shapes consistent with the module: B x C x F x T complex STFT.
    B, C, F, T = 2, 4, 16, 128
    key = jax.random.PRNGKey(0)
    kr, ki = jax.random.split(key)
    real = jax.random.normal(kr, (B, C, F, T), dtype=jnp.float32)
    imag = jax.random.normal(ki, (B, C, F, T), dtype=jnp.float32)
    M = C * (C - 1) // 2

    # cos-IPD: fused channels-resident single pass (default path)
    out_cos = jax.block_until_ready(ipd_feature(real, imag, cos=True))
    ref_cos = ipd_feature_ref(real, imag, cos=True)
    assert out_cos.shape == (B, M * F, T), out_cos.shape
    assert jnp.allclose(out_cos, ref_cos, atol=2e-5, rtol=2e-5), "cos-IPD mismatch"

    # raw phase-difference path
    out_raw = jax.block_until_ready(ipd_feature(real, imag, cos=False))
    ref_raw = ipd_feature_ref(real, imag, cos=False)
    assert jnp.allclose(out_raw, ref_raw, atol=1e-4, rtol=1e-4), "raw IPD mismatch"

    # user-supplied (unsorted) pair list
    pairs = [(2, 0), (1, 3), (0, 3)]
    out_c = jax.block_until_ready(ipd_feature(real, imag, pair_idx=pairs, cos=True))
    ref_c = ipd_feature_ref(real, imag, pair_idx=pairs, cos=True)
    assert out_c.shape == (B, len(pairs) * F, T), out_c.shape
    assert jnp.allclose(out_c, ref_c, atol=2e-5, rtol=2e-5), "custom-pair mismatch"

    # exact-zero bins (silence / zero padding) must follow angle(0)=0 convention
    real_z = real.at[:, 0, :4, :8].set(0.0).at[:, :, 8:, :8].set(0.0)
    imag_z = imag.at[:, 0, :4, :8].set(0.0).at[:, :, 8:, :8].set(0.0)
    out_z = jax.block_until_ready(ipd_feature(real_z, imag_z, cos=True))
    ref_z = ipd_feature_ref(real_z, imag_z, cos=True)
    assert jnp.allclose(out_z, ref_z, atol=2e-5, rtol=2e-5), "zero-bin mismatch"

    # large-M fallback kernels (scalar-prefetched pair grid), forced for testing
    out_pc = jax.block_until_ready(ipd_feature(real, imag, cos=True, _force="pairs"))
    assert jnp.allclose(out_pc, ref_cos, atol=2e-5, rtol=2e-5), "pair-grid cos mismatch"
    out_pr = jax.block_until_ready(ipd_feature(real, imag, cos=False, _force="pairs"))
    assert jnp.allclose(out_pr, ref_raw, atol=1e-4, rtol=1e-4), "pair-grid raw mismatch"

    # bf16 inputs: streams stay bf16 (no f32 intermediate), math in f32 in-kernel
    real16 = real.astype(jnp.bfloat16)
    imag16 = imag.astype(jnp.bfloat16)
    out_16 = jax.block_until_ready(ipd_feature(real16, imag16, cos=True))
    ref_16 = ipd_feature_ref(real16.astype(jnp.float32),
                             imag16.astype(jnp.float32), cos=True)
    assert out_16.dtype == jnp.bfloat16
    assert jnp.allclose(out_16.astype(jnp.float32), ref_16, atol=2e-2, rtol=2e-2), \
        "bf16 mismatch"

    print("KERNEL_OK")
</pallas_src>

<mosaic_0001>
module attributes {stable_mosaic.version = 11 : i64} {
  func.func @kernel(%arg0: i32, %arg1: i32, %arg2: memref<2x4x16x128xf32, #tpu.memory_space<vmem>>, %arg3: memref<2x4x16x128xf32, #tpu.memory_space<vmem>>, %arg4: memref<2x6x16x128xf32, #tpu.memory_space<vmem>>) attributes {dimension_semantics = [#tpu.dimension_semantics<parallel>, #tpu.dimension_semantics<parallel>], iteration_bounds = array<i64: 1, 1>, scalar_prefetch = 0 : i64, scratch_operands = 0 : i64, tpu.core_type = #tpu.core_type<tc>, window_params = [{transform_indices = @transform_0, window_bounds = array<i64: 2, 4, 16, 128>}, {transform_indices = @transform_1, window_bounds = array<i64: 2, 4, 16, 128>}, {transform_indices = @transform_2, window_bounds = array<i64: 2, 6, 16, 128>}]} {
    %c0 = arith.constant 0 : index
    %c0_0 = arith.constant 0 : index
    %c0_1 = arith.constant 0 : index
    %c0_2 = arith.constant 0 : index
    %0 = vector.load %arg2[%c0, %c0_0, %c0_1, %c0_2] : memref<2x4x16x128xf32, #tpu.memory_space<vmem>>, vector<2x4x16x128xf32>
    %c0_3 = arith.constant 0 : index
    %c0_4 = arith.constant 0 : index
    %c0_5 = arith.constant 0 : index
    %c0_6 = arith.constant 0 : index
    %1 = vector.load %arg3[%c0_3, %c0_4, %c0_5, %c0_6] : memref<2x4x16x128xf32, #tpu.memory_space<vmem>>, vector<2x4x16x128xf32>
    %2 = arith.mulf %0, %0 : vector<2x4x16x128xf32>
    %3 = arith.mulf %1, %1 : vector<2x4x16x128xf32>
    %4 = arith.addf %2, %3 : vector<2x4x16x128xf32>
    %cst = arith.constant 0.000000e+00 : f32
    %5 = vector.broadcast %cst : f32 to vector<2x4x16x128xf32>
    %6 = arith.cmpf ogt, %4, %5 : vector<2x4x16x128xf32>
    %cst_7 = arith.constant 1.000000e+00 : f32
    %7 = vector.broadcast %cst_7 : f32 to vector<2x4x16x128xf32>
    %8 = arith.select %6, %4, %7 : vector<2x4x16x128xi1>, vector<2x4x16x128xf32>
    %9 = math.rsqrt %8 : vector<2x4x16x128xf32>
    %10 = arith.mulf %0, %9 : vector<2x4x16x128xf32>
    %cst_8 = arith.constant 1.000000e+00 : f32
    %11 = vector.broadcast %cst_8 : f32 to vector<2x4x16x128xf32>
    %12 = arith.select %6, %10, %11 : vector<2x4x16x128xi1>, vector<2x4x16x128xf32>
    %13 = arith.mulf %1, %9 : vector<2x4x16x128xf32>
    %cst_9 = arith.constant 0.000000e+00 : f32
    %14 = vector.broadcast %cst_9 : f32 to vector<2x4x16x128xf32>
    %15 = arith.select %6, %13, %14 : vector<2x4x16x128xi1>, vector<2x4x16x128xf32>
    %16 = vector.extract_strided_slice %12 {offsets = [0, 0, 0, 0], sizes = [2, 1, 16, 128], strides = [1, 1, 1, 1]} : vector<2x4x16x128xf32> to vector<2x1x16x128xf32>
    %17 = vector.shape_cast %16 : vector<2x1x16x128xf32> to vector<2x16x128xf32>
    %18 = vector.extract_strided_slice %12 {offsets = [0, 1, 0, 0], sizes = [2, 1, 16, 128], strides = [1, 1, 1, 1]} : vector<2x4x16x128xf32> to vector<2x1x16x128xf32>
    %19 = vector.shape_cast %18 : vector<2x1x16x128xf32> to vector<2x16x128xf32>
    %20 = arith.mulf %17, %19 : vector<2x16x128xf32>
    %21 = vector.extract_strided_slice %15 {offsets = [0, 0, 0, 0], sizes = [2, 1, 16, 128], strides = [1, 1, 1, 1]} : vector<2x4x16x128xf32> to vector<2x1x16x128xf32>
    %22 = vector.shape_cast %21 : vector<2x1x16x128xf32> to vector<2x16x128xf32>
    %23 = vector.extract_strided_slice %15 {offsets = [0, 1, 0, 0], sizes = [2, 1, 16, 128], strides = [1, 1, 1, 1]} : vector<2x4x16x128xf32> to vector<2x1x16x128xf32>
    %24 = vector.shape_cast %23 : vector<2x1x16x128xf32> to vector<2x16x128xf32>
    %25 = arith.mulf %22, %24 : vector<2x16x128xf32>
    %26 = arith.addf %20, %25 : vector<2x16x128xf32>
    %c0_10 = arith.constant 0 : index
    %c0_11 = arith.constant 0 : index
    %c0_12 = arith.constant 0 : index
    %c0_13 = arith.constant 0 : index
    %27 = vector.load %arg4[%c0_10, %c0_11, %c0_12, %c0_13] : memref<2x6x16x128xf32, #tpu.memory_space<vmem>>, vector<2x1x16x128xf32>
    %28 = vector.shape_cast %27 : vector<2x1x16x128xf32> to vector<2x16x128xf32>
    %29 = vector.shape_cast %26 : vector<2x16x128xf32> to vector<2x1x16x128xf32>
    tpu.vector_store %arg4[%c0_10, %c0_11, %c0_12, %c0_13], %29 {strides = array<i32>} : memref<2x6x16x128xf32, #tpu.memory_space<vmem>>, vector<2x1x16x128xf32>,
    %30 = vector.extract_strided_slice %12 {offsets = [0, 0, 0, 0], sizes = [2, 1, 16, 128], strides = [1, 1, 1, 1]} : vector<2x4x16x128xf32> to vector<2x1x16x128xf32>
    %31 = vector.shape_cast %30 : vector<2x1x16x128xf32> to vector<2x16x128xf32>
    %32 = vector.extract_strided_slice %12 {offsets = [0, 2, 0, 0], sizes = [2, 1, 16, 128], strides = [1, 1, 1, 1]} : vector<2x4x16x128xf32> to vector<2x1x16x128xf32>
    %33 = vector.shape_cast %32 : vector<2x1x16x128xf32> to vector<2x16x128xf32>
    %34 = arith.mulf %31, %33 : vector<2x16x128xf32>
    %35 = vector.extract_strided_slice %15 {offsets = [0, 0, 0, 0], sizes = [2, 1, 16, 128], strides = [1, 1, 1, 1]} : vector<2x4x16x128xf32> to vector<2x1x16x128xf32>
    %36 = vector.shape_cast %35 : vector<2x1x16x128xf32> to vector<2x16x128xf32>
    %37 = vector.extract_strided_slice %15 {offsets = [0, 2, 0, 0], sizes = [2, 1, 16, 128], strides = [1, 1, 1, 1]} : vector<2x4x16x128xf32> to vector<2x1x16x128xf32>
    %38 = vector.shape_cast %37 : vector<2x1x16x128xf32> to vector<2x16x128xf32>
    %39 = arith.mulf %36, %38 : vector<2x16x128xf32>
    %40 = arith.addf %34, %39 : vector<2x16x128xf32>
    %c0_14 = arith.constant 0 : index
    %c1 = arith.constant 1 : index
    %c0_15 = arith.constant 0 : index
    %c0_16 = arith.constant 0 : index
    %41 = vector.load %arg4[%c0_14, %c1, %c0_15, %c0_16] : memref<2x6x16x128xf32, #tpu.memory_space<vmem>>, vector<2x1x16x128xf32>
    %42 = vector.shape_cast %41 : vector<2x1x16x128xf32> to vector<2x16x128xf32>
    %43 = vector.shape_cast %40 : vector<2x16x128xf32> to vector<2x1x16x128xf32>
    tpu.vector_store %arg4[%c0_14, %c1, %c0_15, %c0_16], %43 {strides = array<i32>} : memref<2x6x16x128xf32, #tpu.memory_space<vmem>>, vector<2x1x16x128xf32>,
    %44 = vector.extract_strided_slice %12 {offsets = [0, 0, 0, 0], sizes = [2, 1, 16, 128], strides = [1, 1, 1, 1]} : vector<2x4x16x128xf32> to vector<2x1x16x128xf32>
    %45 = vector.shape_cast %44 : vector<2x1x16x128xf32> to vector<2x16x128xf32>
    %46 = vector.extract_strided_slice %12 {offsets = [0, 3, 0, 0], sizes = [2, 1, 16, 128], strides = [1, 1, 1, 1]} : vector<2x4x16x128xf32> to vector<2x1x16x128xf32>
    %47 = vector.shape_cast %46 : vector<2x1x16x128xf32> to vector<2x16x128xf32>
    %48 = arith.mulf %45, %47 : vector<2x16x128xf32>
    %49 = vector.extract_strided_slice %15 {offsets = [0, 0, 0, 0], sizes = [2, 1, 16, 128], strides = [1, 1, 1, 1]} : vector<2x4x16x128xf32> to vector<2x1x16x128xf32>
    %50 = vector.shape_cast %49 : vector<2x1x16x128xf32> to vector<2x16x128xf32>
    %51 = vector.extract_strided_slice %15 {offsets = [0, 3, 0, 0], sizes = [2, 1, 16, 128], strides = [1, 1, 1, 1]} : vector<2x4x16x128xf32> to vector<2x1x16x128xf32>
    %52 = vector.shape_cast %51 : vector<2x1x16x128xf32> to vector<2x16x128xf32>
    %53 = arith.mulf %50, %52 : vector<2x16x128xf32>
    %54 = arith.addf %48, %53 : vector<2x16x128xf32>
    %c0_17 = arith.constant 0 : index
    %c2 = arith.constant 2 : index
    %c0_18 = arith.constant 0 : index
    %c0_19 = arith.constant 0 : index
    %55 = vector.load %arg4[%c0_17, %c2, %c0_18, %c0_19] : memref<2x6x16x128xf32, #tpu.memory_space<vmem>>, vector<2x1x16x128xf32>
    %56 = vector.shape_cast %55 : vector<2x1x16x128xf32> to vector<2x16x128xf32>
    %57 = vector.shape_cast %54 : vector<2x16x128xf32> to vector<2x1x16x128xf32>
    tpu.vector_store %arg4[%c0_17, %c2, %c0_18, %c0_19], %57 {strides = array<i32>} : memref<2x6x16x128xf32, #tpu.memory_space<vmem>>, vector<2x1x16x128xf32>,
    %58 = vector.extract_strided_slice %12 {offsets = [0, 1, 0, 0], sizes = [2, 1, 16, 128], strides = [1, 1, 1, 1]} : vector<2x4x16x128xf32> to vector<2x1x16x128xf32>
    %59 = vector.shape_cast %58 : vector<2x1x16x128xf32> to vector<2x16x128xf32>
    %60 = vector.extract_strided_slice %12 {offsets = [0, 2, 0, 0], sizes = [2, 1, 16, 128], strides = [1, 1, 1, 1]} : vector<2x4x16x128xf32> to vector<2x1x16x128xf32>
    %61 = vector.shape_cast %60 : vector<2x1x16x128xf32> to vector<2x16x128xf32>
    %62 = arith.mulf %59, %61 : vector<2x16x128xf32>
    %63 = vector.extract_strided_slice %15 {offsets = [0, 1, 0, 0], sizes = [2, 1, 16, 128], strides = [1, 1, 1, 1]} : vector<2x4x16x128xf32> to vector<2x1x16x128xf32>
    %64 = vector.shape_cast %63 : vector<2x1x16x128xf32> to vector<2x16x128xf32>
    %65 = vector.extract_strided_slice %15 {offsets = [0, 2, 0, 0], sizes = [2, 1, 16, 128], strides = [1, 1, 1, 1]} : vector<2x4x16x128xf32> to vector<2x1x16x128xf32>
    %66 = vector.shape_cast %65 : vector<2x1x16x128xf32> to vector<2x16x128xf32>
    %67 = arith.mulf %64, %66 : vector<2x16x128xf32>
    %68 = arith.addf %62, %67 : vector<2x16x128xf32>
    %c0_20 = arith.constant 0 : index
    %c3 = arith.constant 3 : index
    %c0_21 = arith.constant 0 : index
    %c0_22 = arith.constant 0 : index
    %69 = vector.load %arg4[%c0_20, %c3, %c0_21, %c0_22] : memref<2x6x16x128xf32, #tpu.memory_space<vmem>>, vector<2x1x16x128xf32>
    %70 = vector.shape_cast %69 : vector<2x1x16x128xf32> to vector<2x16x128xf32>
    %71 = vector.shape_cast %68 : vector<2x16x128xf32> to vector<2x1x16x128xf32>
    tpu.vector_store %arg4[%c0_20, %c3, %c0_21, %c0_22], %71 {strides = array<i32>} : memref<2x6x16x128xf32, #tpu.memory_space<vmem>>, vector<2x1x16x128xf32>,
    %72 = vector.extract_strided_slice %12 {offsets = [0, 1, 0, 0], sizes = [2, 1, 16, 128], strides = [1, 1, 1, 1]} : vector<2x4x16x128xf32> to vector<2x1x16x128xf32>
    %73 = vector.shape_cast %72 : vector<2x1x16x128xf32> to vector<2x16x128xf32>
    %74 = vector.extract_strided_slice %12 {offsets = [0, 3, 0, 0], sizes = [2, 1, 16, 128], strides = [1, 1, 1, 1]} : vector<2x4x16x128xf32> to vector<2x1x16x128xf32>
    %75 = vector.shape_cast %74 : vector<2x1x16x128xf32> to vector<2x16x128xf32>
    %76 = arith.mulf %73, %75 : vector<2x16x128xf32>
    %77 = vector.extract_strided_slice %15 {offsets = [0, 1, 0, 0], sizes = [2, 1, 16, 128], strides = [1, 1, 1, 1]} : vector<2x4x16x128xf32> to vector<2x1x16x128xf32>
    %78 = vector.shape_cast %77 : vector<2x1x16x128xf32> to vector<2x16x128xf32>
    %79 = vector.extract_strided_slice %15 {offsets = [0, 3, 0, 0], sizes = [2, 1, 16, 128], strides = [1, 1, 1, 1]} : vector<2x4x16x128xf32> to vector<2x1x16x128xf32>
    %80 = vector.shape_cast %79 : vector<2x1x16x128xf32> to vector<2x16x128xf32>
    %81 = arith.mulf %78, %80 : vector<2x16x128xf32>
    %82 = arith.addf %76, %81 : vector<2x16x128xf32>
    %c0_23 = arith.constant 0 : index
    %c4 = arith.constant 4 : index
    %c0_24 = arith.constant 0 : index
    %c0_25 = arith.constant 0 : index
    %83 = vector.load %arg4[%c0_23, %c4, %c0_24, %c0_25] : memref<2x6x16x128xf32, #tpu.memory_space<vmem>>, vector<2x1x16x128xf32>
    %84 = vector.shape_cast %83 : vector<2x1x16x128xf32> to vector<2x16x128xf32>
    %85 = vector.shape_cast %82 : vector<2x16x128xf32> to vector<2x1x16x128xf32>
    tpu.vector_store %arg4[%c0_23, %c4, %c0_24, %c0_25], %85 {strides = array<i32>} : memref<2x6x16x128xf32, #tpu.memory_space<vmem>>, vector<2x1x16x128xf32>,
    %86 = vector.extract_strided_slice %12 {offsets = [0, 2, 0, 0], sizes = [2, 1, 16, 128], strides = [1, 1, 1, 1]} : vector<2x4x16x128xf32> to vector<2x1x16x128xf32>
    %87 = vector.shape_cast %86 : vector<2x1x16x128xf32> to vector<2x16x128xf32>
    %88 = vector.extract_strided_slice %12 {offsets = [0, 3, 0, 0], sizes = [2, 1, 16, 128], strides = [1, 1, 1, 1]} : vector<2x4x16x128xf32> to vector<2x1x16x128xf32>
    %89 = vector.shape_cast %88 : vector<2x1x16x128xf32> to vector<2x16x128xf32>
    %90 = arith.mulf %87, %89 : vector<2x16x128xf32>
    %91 = vector.extract_strided_slice %15 {offsets = [0, 2, 0, 0], sizes = [2, 1, 16, 128], strides = [1, 1, 1, 1]} : vector<2x4x16x128xf32> to vector<2x1x16x128xf32>
    %92 = vector.shape_cast %91 : vector<2x1x16x128xf32> to vector<2x16x128xf32>
    %93 = vector.extract_strided_slice %15 {offsets = [0, 3, 0, 0], sizes = [2, 1, 16, 128], strides = [1, 1, 1, 1]} : vector<2x4x16x128xf32> to vector<2x1x16x128xf32>
    %94 = vector.shape_cast %93 : vector<2x1x16x128xf32> to vector<2x16x128xf32>
    %95 = arith.mulf %92, %94 : vector<2x16x128xf32>
    %96 = arith.addf %90, %95 : vector<2x16x128xf32>
    %c0_26 = arith.constant 0 : index
    %c5 = arith.constant 5 : index
    %c0_27 = arith.constant 0 : index
    %c0_28 = arith.constant 0 : index
    %97 = vector.load %arg4[%c0_26, %c5, %c0_27, %c0_28] : memref<2x6x16x128xf32, #tpu.memory_space<vmem>>, vector<2x1x16x128xf32>
    %98 = vector.shape_cast %97 : vector<2x1x16x128xf32> to vector<2x16x128xf32>
    %99 = vector.shape_cast %96 : vector<2x16x128xf32> to vector<2x1x16x128xf32>
    tpu.vector_store %arg4[%c0_26, %c5, %c0_27, %c0_28], %99 {strides = array<i32>} : memref<2x6x16x128xf32, #tpu.memory_space<vmem>>, vector<2x1x16x128xf32>,
    return
  }
  func.func @transform_0(%arg0: i32, %arg1: i32) -> (i32, i32, i32, i32) {
    %c0_i32 = arith.constant 0 : i32
    %c0_i32_0 = arith.constant 0 : i32
    %c0_i32_1 = arith.constant 0 : i32
    return %c0_i32, %c0_i32_0, %arg0, %arg1 : i32, i32, i32, i32
  }
  func.func @transform_1(%arg0: i32, %arg1: i32) -> (i32, i32, i32, i32) {
    %c0_i32 = arith.constant 0 : i32
    %c0_i32_0 = arith.constant 0 : i32
    %c0_i32_1 = arith.constant 0 : i32
    return %c0_i32, %c0_i32_0, %arg0, %arg1 : i32, i32, i32, i32
  }
  func.func @transform_2(%arg0: i32, %arg1: i32) -> (i32, i32, i32, i32) {
    %c0_i32 = arith.constant 0 : i32
    %c0_i32_0 = arith.constant 0 : i32
    %c0_i32_1 = arith.constant 0 : i32
    return %c0_i32, %c0_i32_0, %arg0, %arg1 : i32, i32, i32, i32
  }
}

</mosaic_0001>

<bundles_post_ra>
// kernel: tpu_custom_call.1
= control target key start
LH: loop header
LB: loop body
LE: loop exit
PB: predicated region body
PF: predicated region fallthrough
CT: control target
= control target key end

     0   :  { %7 = vsyncpa [#allocation3], 0  ;;  %s968_s0 = inlined_call_operand.hbm [shape: f32[2,4,16,128], index: 0, kind: input, shape index: {}]   ;;  %s969_s1 = inlined_call_operand.hbm [shape: f32[2,4,16,128], index: 1, kind: input, shape index: {}]   ;;  %s970_s2 = inlined_call_operand.hbm [shape: f32[2,6,16,128], index: 2, kind: output, shape index: {}]  }
   0x1   :  { %8 = vsyncpa [#allocation6], 0 }
   0x2   :  { %9 = vsyncpa [#allocation4], 0  ;;  %s460_s9 = smov [#allocation2]   ;;  %s388_s13 = scalar_lea.hbm %s968_s0, 2048 }
   0x3   :  { %s15_s10 = sshll.u32 %s460_s9, 4  ;;  %p389_p0 = scmp.ne.s32.totalorder %s968_s0, %s388_s13  ;;  %s16_s10 = int_to_ptr.vmem [resolvable:$true] %s15_s10 }
   0x4   :  { %p392_p1 = scmp.lt.u32.totalorder %s388_s13, %s968_s0 }
   0x6   :  { %p394_p2 = pnand %p392_p1, %p389_p0 }
   0x8   :  { %397 = shalt.err (!%p394_p2)
}
   0x9   :  { %s398_s18 = scalar_lea.vmem %s16_s10, 2048  ;;  %p403_p4 = scmp.lt.s32.totalorder %s16_s10, %s16_s10 }
   0xa   :  { %p399_p3 = scmp.ne.s32.totalorder %s16_s10, %s398_s18  ;;  %p404_p5 = scmp.lt.s32.totalorder %s398_s18, %s398_s18 }
   0xc   :  { %p405_p6 = por %p404_p5, %p403_p4 }
   0xe   :  { %p406_p7 = pnand %p405_p6, %p399_p3 }
  0x10   :  { %409 = shalt.err (!%p406_p7)
}
  0x11   :  { %s461_s19 = smov 128   ;;  %s462_s20 = smov 8  }
  0x12   :  { %21 = dma.hbm_to_vmem [thread:$0]  %s968_s0, 2048, %s16_s10, [#allocation3], %s461_s19, %s461_s19, %s462_s20  }
  0x13   :  { %s463_s23 = smov [#allocation5]   ;;  %s410_s27 = scalar_lea.hbm %s969_s1, 2048 }
  0x14   :  { %s27_s24 = sshll.u32 %s463_s23, 4  ;;  %p411_p8 = scmp.ne.s32.totalorder %s969_s1, %s410_s27  ;;  %s28_s24 = int_to_ptr.vmem [resolvable:$true] %s27_s24 }
  0x15   :  { %p414_p9 = scmp.lt.u32.totalorder %s410_s27, %s969_s1 }
  0x17   :  { %p416_p10 = pnand %p414_p9, %p411_p8 }
  0x19   :  { %419 = shalt.err (!%p416_p10)
}
  0x1a   :  { %s420_s4 = scalar_lea.vmem %s28_s24, 2048  ;;  %p425_p12 = scmp.lt.s32.totalorder %s28_s24, %s28_s24 }
  0x1b   :  { %p421_p11 = scmp.ne.s32.totalorder %s28_s24, %s420_s4  ;;  %p426_p13 = scmp.lt.s32.totalorder %s420_s4, %s420_s4 }
  0x1d   :  { %p427_p0 = por %p426_p13, %p425_p12 }
  0x1f   :  { %p428_p1 = pnand %p427_p0, %p421_p11 }
  0x21   :  { %431 = shalt.err (!%p428_p1)
}
  0x22   :  { %33 = dma.hbm_to_vmem [thread:$0]  %s969_s1, 2048, %s28_s24, [#allocation6], %s461_s19, %s461_s19, %s462_s20  }
  0x23   :  { %454 = dma.done.wait [#allocation3], 2048  }
  0x24   :  { %455 = vsyncadd [#allocation3], 4294965248 }
  0x25   :  { %456 = dma.done.wait [#allocation6], 2048  }
  0x26   :  { %457 = vsyncadd [#allocation6], 4294965248  ;;  %v510_v0 = vld [vmem:[#allocation2] sm:$0xff]  ;;  %v512_v1 = vld [vmem:[#allocation2 + $0x10] sm:$0xff]  ;;  %s464_s1 = smov [#allocation7]  }
  0x27   :  { %v514_v2 = vld [vmem:[#allocation5] sm:$0xff]  ;;  %v516_v3 = vld [vmem:[#allocation5 + $0x10] sm:$0xff]  ;;  %v72_v4 = vmul.f32 %v510_v0, %v510_v0  ;;  %v74_v5 = vmul.f32 %v512_v1, %v512_v1  ;;  %v524_v7 = vld [vmem:[#allocation2 + $0x8] sm:$0xff]  ;;  %s338_s6 = sshll.u32 %s464_s1, 4  ;;  %s339_s6 = int_to_ptr.vmem [resolvable:$true] %s338_s6 }
  0x28   :  { %v88_v6 = vmul.f32 %v514_v2, %v514_v2  ;;  %v526_v8 = vld [vmem:[#allocation2 + $0x18] sm:$0xff]  ;;  %v90_v9 = vmul.f32 %v516_v3, %v516_v3  ;;  %v530_v10 = vld [vmem:[#allocation5 + $0x8] sm:$0xff]  ;;  %v73_v12 = vmul.f32 %v524_v7, %v524_v7  ;;  %v538_v14 = vld [vmem:[#allocation2 + $0x40] sm:$0xff]  ;;  %s432_s7 = scalar_lea.vmem %s339_s6, 3072  ;;  %p437_p3 = scmp.lt.s32.totalorder %s339_s6, %s339_s6 }
  0x29   :  { %v532_v11 = vld [vmem:[#allocation5 + $0x18] sm:$0xff]  ;;  %v75_v13 = vmul.f32 %v526_v8, %v526_v8  ;;  %v89_v16 = vmul.f32 %v530_v10, %v530_v10  ;;  %v546_v18 = vld [vmem:[#allocation2 + $0x50] sm:$0xff]  ;;  %v548_v19 = vld [vmem:[#allocation5 + $0x40] sm:$0xff]  ;;  %v80_v21 = vmul.f32 %v538_v14, %v538_v14  ;;  %p433_p2 = scmp.ne.s32.totalorder %s339_s6, %s432_s7  ;;  %p438_p4 = scmp.lt.s32.totalorder %s432_s7, %s432_s7 }
  0x2a   :  { %v540_v15 = vadd.f32 %v88_v6, %v72_v4  ;;  %v91_v17 = vmul.f32 %v532_v11, %v532_v11  ;;  %v550_v20 = vld [vmem:[#allocation5 + $0x50] sm:$0xff]  ;;  %v554_v22 = vadd.f32 %v90_v9, %v74_v5  ;;  %v82_v23 = vmul.f32 %v546_v18, %v546_v18  ;;  %v562_v26 = vld [vmem:[#allocation2 + $0x48] sm:$0xff]  ;;  %v579_v33 = vld [vmem:[#allocation2 + $0x58] sm:$0xff] }
  0x2b   :  { %v96_v24 = vmul.f32 %v548_v19, %v548_v19  ;;  %v98_v25 = vmul.f32 %v550_v20, %v550_v20  ;;  %v565_v27 = vadd.f32 %v89_v16, %v73_v12  ;;  %v81_v29 = vmul.f32 %v562_v26, %v562_v26  ;;  %v586_v35 = vld [vmem:[#allocation5 + $0x48] sm:$0xff]  ;;  %v588_v36 = vld [vmem:[#allocation5 + $0x58] sm:$0xff]  ;;  %v597_v39 = vld [vmem:[#allocation2 + $0x20] sm:$0xff]  ;;  %p439_p5 = por %p438_p4, %p437_p3 }
  0x2c   :  { %vm120_vm0 = vcmp.gt.f32.partialorder %v540_v15, 0.0  ;;  %v567_v28 = vadd.f32 %v91_v17, %v75_v13  ;;  %vm122_vm1 = vcmp.gt.f32.partialorder %v554_v22, 0.0  ;;  %v599_v40 = vld [vmem:[#allocation5 + $0x20] sm:$0xff]  ;;  %v601_v41 = vld [vmem:[#allocation2 + $0x28] sm:$0xff]  ;;  %v83_v43 = vmul.f32 %v579_v33, %v579_v33  ;;  %v652_v4 = vld [vmem:[#allocation2 + $0x30] sm:$0xff] }
  0x2d   :  { %v136_v30 = vsel %vm120_vm0, %v540_v15, 1.0  ;;  %v575_v31 = vadd.f32 %v96_v24, %v80_v21  ;;  %v577_v32 = vadd.f32 %v98_v25, %v82_v23  ;;  %v138_v34 = vsel %vm122_vm1, %v554_v22, 1.0  ;;  %v609_v44 = vld [vmem:[#allocation5 + $0x28] sm:$0xff]  ;;  %v618_v48 = vld [vmem:[#allocation2 + $0x60] sm:$0xff]  ;;  %p440_p6 = pnand %p439_p5, %p433_p2 }
  0x2e   :  { %356 = vrsqrt.f32 %v136_v30  ;;  %vm121_vm2 = vcmp.gt.f32.partialorder %v565_v27, 0.0  ;;  %vm123_vm3 = vcmp.gt.f32.partialorder %v567_v28, 0.0  ;;  %v97_v46 = vmul.f32 %v586_v35, %v586_v35  ;;  %v620_v49 = vld [vmem:[#allocation5 + $0x60] sm:$0xff]  ;;  %v622_v50 = vld [vmem:[#allocation2 + $0x68] sm:$0xff] }
  0x2f   :  { %358 = vrsqrt.f32 %v138_v34  ;;  %v137_v37 = vsel %vm121_vm2, %v565_v27, 1.0  ;;  %v139_v38 = vsel %vm123_vm3, %v567_v28, 1.0  ;;  %vm128_vm4 = vcmp.gt.f32.partialorder %v575_v31, 0.0  ;;  %v630_v54 = vld [vmem:[#allocation5 + $0x68] sm:$0xff] }
  0x30   :  { %360 = vrsqrt.f32 %v137_v37  ;;  %vm130_vm5 = vcmp.gt.f32.partialorder %v577_v32, 0.0  ;;  %v144_v42 = vsel %vm128_vm4, %v575_v31, 1.0  ;;  %v99_v47 = vmul.f32 %v588_v36, %v588_v36 }
  0x31   :  { %362 = vrsqrt.f32 %v139_v38  ;;  %v146_v45 = vsel %vm130_vm5, %v577_v32, 1.0  ;;  %v76_v51 = vmul.f32 %v597_v39, %v597_v39  ;;  %v92_v52 = vmul.f32 %v599_v40, %v599_v40 }
  0x32   :  { %364 = vrsqrt.f32 %v144_v42  ;;  %v77_v53 = vmul.f32 %v601_v41, %v601_v41  ;;  %v632_v55 = vadd.f32 %v97_v46, %v81_v29  ;;  %v634_v56 = vadd.f32 %v99_v47, %v83_v43 }
  0x33   :  { %366 = vrsqrt.f32 %v146_v45  ;;  %v93_v57 = vmul.f32 %v609_v44, %v609_v44  ;;  %v638_v58 = vadd.f32 %v92_v52, %v76_v51  ;;  %v84_v59 = vmul.f32 %v618_v48, %v618_v48 }
  0x34   :  { %v100_v60 = vmul.f32 %v620_v49, %v620_v49  ;;  %v85_v61 = vmul.f32 %v622_v50, %v622_v50  ;;  %vm129_vm6 = vcmp.gt.f32.partialorder %v632_v55, 0.0  ;;  %vm131_vm7 = vcmp.gt.f32.partialorder %v634_v56, 0.0 }
  0x35   :  { %v648_v62 = vadd.f32 %v93_v57, %v77_v53  ;;  %v101_v63 = vmul.f32 %v630_v54, %v630_v54  ;;  %v145_v5 = vsel %vm129_vm6, %v632_v55, 1.0  ;;  %v147_v6 = vsel %vm131_vm7, %v634_v56, 1.0  ;;  %v797_v56 = vld [vmem:[#allocation5 + $0x38] sm:$0xff] }
  0x36   :  { %vm124_vm8 = vcmp.gt.f32.partialorder %v638_v58, 0.0  ;;  %v661_v9 = vadd.f32 %v100_v60, %v84_v59  ;;  %368 = vrsqrt.f32 %v145_v5  ;;  %v675_v21 = vmul.f32 %v652_v4, %v652_v4 }
  0x37   :  { %v140_v12 = vsel %vm124_vm8, %v638_v58, 1.0  ;;  %vm125_vm9 = vcmp.gt.f32.partialorder %v648_v62, 0.0  ;;  %v667_v13 = vadd.f32 %v101_v63, %v85_v61  ;;  %370 = vrsqrt.f32 %v147_v6  ;;  %v810_v58 = vld [vmem:[#allocation5 + $0x70] sm:$0xff] }
  0x38   :  { %v357_v16 = vpop.eup %356  ;;  %v141_v17 = vsel %vm125_vm9, %v648_v62, 1.0  ;;  %vm132_vm10 = vcmp.gt.f32.partialorder %v661_v9, 0.0  ;;  %372 = vrsqrt.f32 %v140_v12  ;;  %v102_v62 = vmul.f32 %v810_v58, %v810_v58 }
  0x39   :  { %v359_v23 = vpop.eup %358  ;;  %v168_v24 = vmul.f32 %v357_v16, %v510_v0  ;;  %v200_v25 = vmul.f32 %v357_v16, %v514_v2  ;;  %v148_v29 = vsel %vm132_vm10, %v661_v9, 1.0  ;;  %374 = vrsqrt.f32 %v141_v17 }
  0x3a   :  { %v361_v30 = vpop.eup %360  ;;  %v170_v34 = vmul.f32 %v359_v23, %v512_v1  ;;  %v202_v37 = vmul.f32 %v359_v23, %v516_v3  ;;  %vm133_vm11 = vcmp.gt.f32.partialorder %v667_v13, 0.0  ;;  %376 = vrsqrt.f32 %v148_v29 }
  0x3b   :  { %v363_v38 = vpop.eup %362  ;;  %v687_v42 = vsel %vm120_vm0, %v168_v24, 1.0  ;;  %v691_v0 = vsel %vm120_vm0, %v200_v25, 0.0  ;;  %v169_v2 = vmul.f32 %v361_v30, %v524_v7  ;;  %v201_v43 = vmul.f32 %v361_v30, %v530_v10 }
  0x3c   :  { %v365_v45 = vpop.eup %364  ;;  %v697_v1 = vsel %vm122_vm1, %v170_v34, 1.0  ;;  %v701_v3 = vsel %vm122_vm1, %v202_v37, 0.0  ;;  %v171_v46 = vmul.f32 %v363_v38, %v526_v8  ;;  %v203_v47 = vmul.f32 %v363_v38, %v532_v11 }
  0x3d   :  { %v367_v15 = vpop.eup %366  ;;  %v232_v51 = vmul.f32 %v697_v1, %v687_v42  ;;  %v236_v7 = vmul.f32 %v701_v3, %v691_v0  ;;  %v711_v10 = vsel %vm121_vm2, %v169_v2, 1.0  ;;  %v715_v22 = vsel %vm121_vm2, %v201_v43, 0.0  ;;  %v783_v43 = vld [vmem:[#allocation2 + $0x38] sm:$0xff] }
  0x3e   :  { %v719_v8 = vsel %vm123_vm3, %v171_v46, 1.0  ;;  %v723_v11 = vsel %vm123_vm3, %v203_v47, 0.0  ;;  %v176_v52 = vmul.f32 %v365_v45, %v538_v14  ;;  %v178_v53 = vmul.f32 %v367_v15, %v546_v18  ;;  %v741_v18 = vld [vmem:[#allocation5 + $0x30] sm:$0xff] }
  0x3f   :  { %v240_v57 = vadd.f32 %v236_v7, %v232_v51  ;;  %v233_v59 = vmul.f32 %v719_v8, %v711_v10  ;;  %v237_v27 = vmul.f32 %v723_v11, %v715_v22  ;;  %v208_v60 = vmul.f32 %v365_v45, %v548_v19  ;;  %v799_v46 = vld [vmem:[#allocation2 + $0x70] sm:$0xff]  ;;  %v812_v7 = vld [vmem:[#allocation2 + $0x78] sm:$0xff] }
  0x40   :  { %v734_v61 = vsel %vm128_vm4, %v176_v52, 1.0  ;;  %v738_v28 = vsel %vm130_vm5, %v178_v53, 1.0  ;;  %v210_v14 = vmul.f32 %v367_v15, %v550_v20  ;;  %v369_v63 = vpop.eup %368  ;;  %v149_v12 = vsel %vm133_vm11, %v667_v13, 1.0 }
  0x41   :  { %244 = vst [vmem:[#allocation7] sm:$0xff] %v240_v57  ;;  %v241_v5 = vadd.f32 %v237_v27, %v233_v59  ;;  %v745_v6 = vsel %vm128_vm4, %v208_v60, 0.0  ;;  %v234_v19 = vmul.f32 %v738_v28, %v734_v61  ;;  %v371_v16 = vpop.eup %370  ;;  %v177_v17 = vmul.f32 %v369_v63, %v562_v26 }
  0x42   :  { %v754_v20 = vsel %vm130_vm5, %v210_v14, 0.0  ;;  %v209_v23 = vmul.f32 %v369_v63, %v586_v35  ;;  %378 = vrsqrt.f32 %v149_v12  ;;  %v373_v31 = vpop.eup %372  ;;  %v179_v25 = vmul.f32 %v371_v16, %v579_v33  ;;  %v829_v63 = vld [vmem:[#allocation5 + $0x78] sm:$0xff] }
  0x43   :  { %245 = vst [vmem:[#allocation7 + $0x8] sm:$0xff] %v241_v5  ;;  %v238_v24 = vmul.f32 %v754_v20, %v745_v6  ;;  %v211_v29 = vmul.f32 %v371_v16, %v588_v36  ;;  %v94_v30 = vmul.f32 %v741_v18, %v741_v18  ;;  %v375_v32 = vpop.eup %374  ;;  %v766_v34 = vsel %vm129_vm6, %v177_v17, 1.0 }
  0x44   :  { %v770_v26 = vsel %vm129_vm6, %v209_v23, 0.0  ;;  %v172_v35 = vmul.f32 %v373_v31, %v597_v39  ;;  %v204_v37 = vmul.f32 %v373_v31, %v599_v40  ;;  %v776_v33 = vsel %vm131_vm7, %v179_v25, 1.0  ;;  %v377_v5 = vpop.eup %376 }
  0x45   :  { %v242_v38 = vadd.f32 %v238_v24, %v234_v19  ;;  %v780_v36 = vsel %vm131_vm7, %v211_v29, 0.0  ;;  %v173_v2 = vmul.f32 %v375_v32, %v601_v41  ;;  %v235_v55 = vmul.f32 %v776_v33, %v766_v34 }
  0x46   :  { %v239_v39 = vmul.f32 %v780_v36, %v770_v26  ;;  %v791_v40 = vsel %vm124_vm8, %v172_v35, 1.0  ;;  %v795_v45 = vsel %vm124_vm8, %v204_v37, 0.0  ;;  %v205_v51 = vmul.f32 %v375_v32, %v609_v44 }
  0x47   :  { %246 = vst [vmem:[#allocation7 + $0x60] sm:$0xff] %v242_v38  ;;  %v248_v41 = vmul.f32 %v791_v40, %v687_v42  ;;  %v252_v47 = vmul.f32 %v795_v45, %v691_v0  ;;  %v807_v15 = vsel %vm125_vm9, %v173_v2, 1.0  ;;  %v817_v57 = vadd.f32 %v94_v30, %v675_v21 }
  0x48   :  { %v243_v52 = vadd.f32 %v239_v39, %v235_v55  ;;  %v249_v53 = vmul.f32 %v807_v15, %v711_v10  ;;  %v79_v59 = vmul.f32 %v783_v43, %v783_v43  ;;  %v823_v60 = vsel %vm125_vm9, %v205_v51, 0.0 }
  0x49   :  { %v256_v27 = vadd.f32 %v252_v47, %v248_v41  ;;  %v95_v44 = vmul.f32 %v797_v56, %v797_v56  ;;  %v86_v14 = vmul.f32 %v799_v46, %v799_v46  ;;  %v253_v21 = vmul.f32 %v823_v60, %v715_v22 }
  0x4a   :  { %247 = vst [vmem:[#allocation7 + $0x68] sm:$0xff] %v243_v52  ;;  %vm126_vm12 = vcmp.gt.f32.partialorder %v817_v57, 0.0  ;;  %v87_v19 = vmul.f32 %v812_v7, %v812_v7  ;;  %v180_v12 = vmul.f32 %v377_v5, %v618_v48  ;;  %v212_v16 = vmul.f32 %v377_v5, %v620_v49 }
  0x4b   :  { %261 = vst [vmem:[#allocation7 + $0x10] sm:$0xff] %v256_v27  ;;  %v142_v17 = vsel %vm126_vm12, %v817_v57, 1.0  ;;  %v843_v23 = vadd.f32 %v95_v44, %v79_v59  ;;  %v257_v24 = vadd.f32 %v253_v21, %v249_v53  ;;  %v845_v25 = vadd.f32 %v102_v62, %v86_v14 }
  0x4c   :  { %v379_v31 = vpop.eup %378  ;;  %380 = vrsqrt.f32 %v142_v17  ;;  %v103_v29 = vmul.f32 %v829_v63, %v829_v63  ;;  %v851_v30 = vsel %vm132_vm10, %v180_v12, 1.0  ;;  %v855_v48 = vsel %vm132_vm10, %v212_v16, 0.0 }
  0x4d   :  { %v181_v49 = vmul.f32 %v379_v31, %v622_v50  ;;  %v213_v32 = vmul.f32 %v379_v31, %v630_v54  ;;  %262 = vst [vmem:[#allocation7 + $0x18] sm:$0xff] %v257_v24  ;;  %v250_v35 = vmul.f32 %v851_v30, %v734_v61  ;;  %v254_v37 = vmul.f32 %v855_v48, %v745_v6 }
  0x4e   :  { %vm127_vm13 = vcmp.gt.f32.partialorder %v843_v23, 0.0  ;;  %vm134_vm14 = vcmp.gt.f32.partialorder %v845_v25, 0.0  ;;  %v883_v13 = vadd.f32 %v103_v29, %v87_v19  ;;  %v282_v41 = vmul.f32 %v791_v40, %v697_v1 }
  0x4f   :  { %v867_v9 = vsel %vm133_vm11, %v181_v49, 1.0  ;;  %v871_v50 = vsel %vm133_vm11, %v213_v32, 0.0  ;;  %v143_v54 = vsel %vm127_vm13, %v843_v23, 1.0  ;;  %v150_v38 = vsel %vm134_vm14, %v845_v25, 1.0 }
  0x50   :  { %v258_v2 = vadd.f32 %v254_v37, %v250_v35  ;;  %v251_v55 = vmul.f32 %v867_v9, %v766_v34  ;;  %v255_v39 = vmul.f32 %v871_v50, %v770_v26  ;;  %382 = vrsqrt.f32 %v143_v54 }
  0x51   :  { %384 = vrsqrt.f32 %v150_v38  ;;  %v286_v47 = vmul.f32 %v795_v45, %v701_v3  ;;  %v283_v52 = vmul.f32 %v807_v15, %v719_v8  ;;  %v287_v53 = vmul.f32 %v823_v60, %v723_v11 }
  0x52   :  { %263 = vst [vmem:[#allocation7 + $0x70] sm:$0xff] %v258_v2  ;;  %v259_v51 = vadd.f32 %v255_v39, %v251_v55  ;;  %v284_v59 = vmul.f32 %v851_v30, %v738_v28  ;;  %vm135_vm15 = vcmp.gt.f32.partialorder %v883_v13, 0.0  ;;  %v288_v44 = vmul.f32 %v855_v48, %v754_v20 }
  0x53   :  { %v290_v27 = vadd.f32 %v286_v47, %v282_v41  ;;  %v285_v14 = vmul.f32 %v867_v9, %v776_v33  ;;  %v151_v5 = vsel %vm135_vm15, %v883_v13, 1.0  ;;  %v291_v21 = vadd.f32 %v287_v53, %v283_v52 }
  0x54   :  { %264 = vst [vmem:[#allocation7 + $0x78] sm:$0xff] %v259_v51  ;;  %v289_v62 = vmul.f32 %v871_v50, %v780_v36  ;;  %386 = vrsqrt.f32 %v151_v5  ;;  %v292_v19 = vadd.f32 %v288_v44, %v284_v59 }
  0x55   :  { %295 = vst [vmem:[#allocation7 + $0x30] sm:$0xff] %v290_v27  ;;  %296 = vst [vmem:[#allocation7 + $0x38] sm:$0xff] %v291_v21 }
  0x56   :  { %v381_v12 = vpop.eup %380  ;;  %v293_v16 = vadd.f32 %v289_v62, %v285_v14  ;;  %297 = vst [vmem:[#allocation7 + $0x90] sm:$0xff] %v292_v19 }
  0x57   :  { %v174_v17 = vmul.f32 %v381_v12, %v652_v4  ;;  %v206_v31 = vmul.f32 %v381_v12, %v741_v18 }
  0x58   :  { %298 = vst [vmem:[#allocation7 + $0x98] sm:$0xff] %v293_v16 }
  0x59   :  { %v190_v24 = vsel %vm126_vm12, %v174_v17, 1.0  ;;  %v222_v29 = vsel %vm126_vm12, %v206_v31, 0.0 }
  0x5a   :  { %v383_v49 = vpop.eup %382  ;;  %v265_v32 = vmul.f32 %v190_v24, %v687_v42  ;;  %v269_v35 = vmul.f32 %v222_v29, %v691_v0  ;;  %v299_v37 = vmul.f32 %v190_v24, %v697_v1  ;;  %v303_v54 = vmul.f32 %v222_v29, %v701_v3 }
  0x5b   :  { %v385_v4 = vpop.eup %384  ;;  %v175_v18 = vmul.f32 %v383_v49, %v783_v43  ;;  %v207_v38 = vmul.f32 %v383_v49, %v797_v56  ;;  %v316_v2 = vmul.f32 %v190_v24, %v791_v40  ;;  %v320_v55 = vmul.f32 %v222_v29, %v795_v45 }
  0x5c   :  { %v273_v57 = vadd.f32 %v269_v35, %v265_v32  ;;  %v182_v39 = vmul.f32 %v385_v4, %v799_v46  ;;  %v214_v42 = vmul.f32 %v385_v4, %v810_v58  ;;  %v307_v41 = vadd.f32 %v303_v54, %v299_v37 }
  0x5d   :  { %v191_v0 = vsel %vm127_vm13, %v175_v18, 1.0  ;;  %v223_v1 = vsel %vm127_vm13, %v207_v38, 0.0  ;;  %v324_v3 = vadd.f32 %v320_v55, %v316_v2 }
  0x5e   :  { %278 = vst [vmem:[#allocation7 + $0x20] sm:$0xff] %v273_v57  ;;  %v266_v43 = vmul.f32 %v191_v0, %v711_v10  ;;  %v270_v40 = vmul.f32 %v223_v1, %v715_v22  ;;  %v198_v45 = vsel %vm134_vm14, %v182_v39, 1.0  ;;  %v230_v56 = vsel %vm134_vm14, %v214_v42, 0.0  ;;  %312 = vst [vmem:[#allocation7 + $0x40] sm:$0xff] %v307_v41  ;;  %v387_v46 = vpop.eup %386 }
  0x5f   :  { %v267_v58 = vmul.f32 %v198_v45, %v734_v61  ;;  %v271_v47 = vmul.f32 %v230_v56, %v745_v6  ;;  %v300_v23 = vmul.f32 %v191_v0, %v719_v8  ;;  %v304_v51 = vmul.f32 %v223_v1, %v723_v11  ;;  %329 = vst [vmem:[#allocation7 + $0x50] sm:$0xff] %v324_v3 }
  0x60   :  { %v274_v10 = vadd.f32 %v270_v40, %v266_v43  ;;  %v183_v22 = vmul.f32 %v387_v46, %v812_v7  ;;  %v215_v52 = vmul.f32 %v387_v46, %v829_v63  ;;  %v301_v53 = vmul.f32 %v198_v45, %v738_v28 }
  0x61   :  { %v275_v25 = vadd.f32 %v271_v47, %v267_v58  ;;  %v308_v59 = vadd.f32 %v304_v51, %v300_v23  ;;  %v305_v27 = vmul.f32 %v230_v56, %v754_v20  ;;  %v317_v61 = vmul.f32 %v191_v0, %v807_v15 }
  0x62   :  { %279 = vst [vmem:[#allocation7 + $0x28] sm:$0xff] %v274_v10  ;;  %v199_v8 = vsel %vm135_vm15, %v183_v22, 1.0  ;;  %v231_v11 = vsel %vm135_vm15, %v215_v52, 0.0  ;;  %v321_v6 = vmul.f32 %v223_v1, %v823_v60  ;;  %v318_v7 = vmul.f32 %v198_v45, %v851_v30 }
  0x63   :  { %280 = vst [vmem:[#allocation7 + $0x80] sm:$0xff] %v275_v25  ;;  %v268_v28 = vmul.f32 %v199_v8, %v766_v34  ;;  %v272_v63 = vmul.f32 %v231_v11, %v770_v26  ;;  %313 = vst [vmem:[#allocation7 + $0x48] sm:$0xff] %v308_v59  ;;  %v309_v20 = vadd.f32 %v305_v27, %v301_v53 }
  0x64   :  { %v302_v15 = vmul.f32 %v199_v8, %v776_v33  ;;  %v306_v44 = vmul.f32 %v231_v11, %v780_v36  ;;  %v325_v14 = vadd.f32 %v321_v6, %v317_v61  ;;  %v322_v5 = vmul.f32 %v230_v56, %v855_v48 }
  0x65   :  { %v319_v13 = vmul.f32 %v199_v8, %v867_v9  ;;  %v276_v60 = vadd.f32 %v272_v63, %v268_v28  ;;  %314 = vst [vmem:[#allocation7 + $0xa0] sm:$0xff] %v309_v20  ;;  %v323_v30 = vmul.f32 %v231_v11, %v871_v50 }
  0x66   :  { %v310_v34 = vadd.f32 %v306_v44, %v302_v15  ;;  %330 = vst [vmem:[#allocation7 + $0x58] sm:$0xff] %v325_v14  ;;  %v326_v26 = vadd.f32 %v322_v5, %v318_v7 }
  0x67   :  { %281 = vst [vmem:[#allocation7 + $0x88] sm:$0xff] %v276_v60  ;;  %v327_v21 = vadd.f32 %v323_v30, %v319_v13 }
  0x68   :  { %315 = vst [vmem:[#allocation7 + $0xa8] sm:$0xff] %v310_v34  ;;  %331 = vst [vmem:[#allocation7 + $0xb0] sm:$0xff] %v326_v26 }
  0x69   :  { %332 = vst [vmem:[#allocation7 + $0xb8] sm:$0xff] %v327_v21 }
  0x6a   :  { %443 = shalt.err (!%p440_p6)
}
  0x6b   :  { %s444_s10 = scalar_lea.hbm %s970_s2, 3072 }
  0x6c   :  { %p445_p7 = scmp.ne.s32.totalorder %s970_s2, %s444_s10  ;;  %p448_p8 = scmp.lt.u32.totalorder %s444_s10, %s970_s2 }
  0x6e   :  { %p450_p9 = pnand %p448_p8, %p445_p7 }
  0x70   :  { %453 = shalt.err (!%p450_p9)
}
  0x71   :  { %344 = dma.vmem_to_hbm [thread:$0]  %s339_s6, 3072, %s970_s2, [#allocation4], %s461_s19, %s461_s19, %s462_s20  }
  0x72   :  { %458 = dma.done.wait [#allocation4], 3072  }
  0x73   :  { %459 = vsyncadd [#allocation4], 4294964224 }
  0x74   :  { %348 = vsyncpa [#allocation3], 1 }
  0x75   :  { %349 = vsyncpa [#allocation6], 1 }
  0x76   :  { %350 = vsyncpa [#allocation4], 1 }

</bundles_post_ra>
